<compile_context>
chip_gen: v5e
topology: v5e:2x2
jax: 0.10.0
libtpu: 0.0.40
codegen_flags: <defaults>
</compile_context>

<pallas_src>
import math

import jax
import jax.numpy as jnp
from jax.experimental import pallas as pl
from jax.experimental.pallas import tpu as pltpu


# ----------------------------------------------------------------------------
# Tiling / budget helpers
# ----------------------------------------------------------------------------
_PER_BLOCK_BYTES = 2 * 1024 * 1024       # target bytes per streamed operand block
_VMEM_LIMIT_BYTES = 48 * 1024 * 1024     # explicit scoped-VMEM limit (v7x-safe)
_RESIDENT_MASK_BYTES = 4 * 1024 * 1024   # keep mask whole in VMEM below this


def _choose_rows(R, row_bytes):
    """VMEM-budgeted row tile (multiple of 8 sublanes) for a [R, D] view."""
    if R <= 8:
        return R
    tr = max(_PER_BLOCK_BYTES // max(row_bytes, 1), 8)
    # keep >=2 grid steps on big inputs so a v7x megacore can split the grid
    tr = min(tr, max(pl.cdiv(R, 2), 8))
    tr = max((tr // 8) * 8, 8)
    return min(tr, R)


def _choose_groups(K, group_bytes):
    """VMEM-budgeted group count for a [K, Rm, D] view (block = (g, Rm, D))."""
    if K <= 1:
        return 1
    g = max(_PER_BLOCK_BYTES // max(group_bytes, 1), 1)
    g = min(g, max(pl.cdiv(K, 2), 1))
    return max(min(g, K), 1)


def _narrow_mask(m):
    # bool masks stream as int8 (4x less HBM traffic than f32); float / int
    # masks keep their dtype so arbitrary mask values stay exact.
    if m.dtype == jnp.bool_:
        return m.astype(jnp.int8)
    return m


def _leading_broadcast_prefix(m_shape, x_shape):
    """Return j if m_shape == (1,)*j + x_shape[j:], else None."""
    nd = len(x_shape)
    j = nd
    while j > 0 and m_shape[j - 1] == x_shape[j - 1]:
        j -= 1
    if all(m_shape[k] == 1 for k in range(j)):
        return j
    return None


def _broadcastable_to(src_shape, dst_shape):
    if len(src_shape) > len(dst_shape):
        extra = src_shape[: len(src_shape) - len(dst_shape)]
        if any(int(e) != 1 for e in extra):
            return False
        src_shape = src_shape[len(src_shape) - len(dst_shape):]
    for s, d in zip(src_shape[::-1], dst_shape[::-1]):
        if int(s) != 1 and int(s) != int(d):
            return False
    return True


# ----------------------------------------------------------------------------
# Pallas kernels
# ----------------------------------------------------------------------------
def _plain_softmax_kernel(x_ref, o_ref):
    x = x_ref[...].astype(jnp.float32)
    e = jnp.exp(x - jnp.max(x, axis=-1, keepdims=True))
    s = jnp.sum(e, axis=-1, keepdims=True)
    o_ref[...] = (e * pl.reciprocal(s, approx=False)).astype(o_ref.dtype)


def _masked_softmax_kernel(x_ref, m_ref, o_ref):
    # PyTorch mask_softmax semantics: max over the *unmasked* input, exp,
    # multiply by mask, sum + 1e-10, divide.  Works for both the 2-D streamed
    # mask ((tr, D) * (tr, D)) and the 3-D resident mask ((g,Rm,D) * (1,Rm,D)).
    x = x_ref[...].astype(jnp.float32)
    m = m_ref[...].astype(jnp.float32)
    e = jnp.exp(x - jnp.max(x, axis=-1, keepdims=True))
    me = e * m
    s = jnp.sum(me, axis=-1, keepdims=True) + 1e-10
    o_ref[...] = (me * pl.reciprocal(s, approx=False)).astype(o_ref.dtype)


def _mv_fused_kernel(x_ref, m0_ref, m1_ref, o_ref, e_ref, acc_ref):
    # grid = (row_groups, n_views); view axis is last ("arbitrary") so x and
    # the output block stay resident across views.  exp(x - max) is computed
    # once per row group into e_ref; per-view terms accumulate in acc_ref.
    v = pl.program_id(1)
    nv = pl.num_programs(1)

    @pl.when(v == 0)
    def _():
        x = x_ref[...].astype(jnp.float32)
        e_ref[...] = jnp.exp(x - jnp.max(x, axis=-1, keepdims=True))
        acc_ref[...] = jnp.zeros_like(acc_ref)

    e = e_ref[...]
    m = m0_ref[...].astype(jnp.float32)           # (1, Rm, D) -> broadcast over g
    me = e * m
    s = jnp.sum(me, axis=-1, keepdims=True) + 1e-10
    acc_ref[...] += me * pl.reciprocal(s, approx=False)

    @pl.when(v == nv - 1)
    def _():
        out = acc_ref[...] * m1_ref[...].astype(jnp.float32)
        o_ref[...] = out.astype(o_ref.dtype)


# ----------------------------------------------------------------------------
# pallas_call wrappers
# ----------------------------------------------------------------------------
def _compiler_params(semantics):
    return pltpu.CompilerParams(dimension_semantics=semantics,
                                vmem_limit_bytes=_VMEM_LIMIT_BYTES)


def _softmax_2d(x2d):
    R, D = x2d.shape
    tr = _choose_rows(R, D * x2d.dtype.itemsize)
    return pl.pallas_call(
        _plain_softmax_kernel,
        out_shape=jax.ShapeDtypeStruct((R, D), x2d.dtype),
        grid_spec=pltpu.PrefetchScalarGridSpec(
            num_scalar_prefetch=0,
            grid=(pl.cdiv(R, tr),),
            in_specs=[pl.BlockSpec((tr, D), lambda i: (i, 0))],
            out_specs=pl.BlockSpec((tr, D), lambda i: (i, 0)),
        ),
        compiler_params=_compiler_params(("parallel",)),
    )(x2d)


def _masked_softmax_stream(x2d, m2d):
    """Full-size mask streamed alongside x ([R, D] view)."""
    R, D = x2d.shape
    row_bytes = D * max(x2d.dtype.itemsize, m2d.dtype.itemsize)
    tr = _choose_rows(R, row_bytes)
    return pl.pallas_call(
        _masked_softmax_kernel,
        out_shape=jax.ShapeDtypeStruct((R, D), x2d.dtype),
        grid_spec=pltpu.PrefetchScalarGridSpec(
            num_scalar_prefetch=0,
            grid=(pl.cdiv(R, tr),),
            in_specs=[pl.BlockSpec((tr, D), lambda i: (i, 0)),
                      pl.BlockSpec((tr, D), lambda i: (i, 0))],
            out_specs=pl.BlockSpec((tr, D), lambda i: (i, 0)),
        ),
        compiler_params=_compiler_params(("parallel",)),
    )(x2d, m2d)


def _masked_softmax_resident(x3d, m3d):
    """Mask broadcasts over leading dims: keep it whole & resident in VMEM."""
    K, Rm, D = x3d.shape
    g = _choose_groups(K, Rm * D * x3d.dtype.itemsize)
    return pl.pallas_call(
        _masked_softmax_kernel,
        out_shape=jax.ShapeDtypeStruct((K, Rm, D), x3d.dtype),
        grid_spec=pltpu.PrefetchScalarGridSpec(
            num_scalar_prefetch=0,
            grid=(pl.cdiv(K, g),),
            in_specs=[pl.BlockSpec((g, Rm, D), lambda i: (i, 0, 0)),
                      pl.BlockSpec((1, Rm, D), lambda i: (0, 0, 0))],
            out_specs=pl.BlockSpec((g, Rm, D), lambda i: (i, 0, 0)),
        ),
        compiler_params=_compiler_params(("parallel",)),
    )(x3d, m3d)


def _mv_fused(x3d, m0_3d, m1_3d):
    """Fused multi-view masked softmax on a [K, Rm, D] view."""
    K, Rm, D = x3d.shape
    N = m0_3d.shape[0]
    g = _choose_groups(K, Rm * D * x3d.dtype.itemsize)
    return pl.pallas_call(
        _mv_fused_kernel,
        out_shape=jax.ShapeDtypeStruct((K, Rm, D), x3d.dtype),
        grid_spec=pltpu.PrefetchScalarGridSpec(
            num_scalar_prefetch=0,
            grid=(pl.cdiv(K, g), N),
            in_specs=[pl.BlockSpec((g, Rm, D), lambda i, v: (i, 0, 0)),
                      pl.BlockSpec((1, Rm, D), lambda i, v: (v, 0, 0)),
                      pl.BlockSpec((1, Rm, D), lambda i, v: (0, 0, 0))],
            out_specs=pl.BlockSpec((g, Rm, D), lambda i, v: (i, 0, 0)),
            scratch_shapes=[pltpu.VMEM((g, Rm, D), jnp.float32),
                            pltpu.VMEM((g, Rm, D), jnp.float32)],
        ),
        compiler_params=_compiler_params(("parallel", "arbitrary")),
    )(x3d, m0_3d, m1_3d)


# ----------------------------------------------------------------------------
# Functional equivalents of mask_softmax / mvmask_softmax
# ----------------------------------------------------------------------------
def mask_softmax_pallas(x, mask=None, dim=-1):
    """JAX/Pallas port of oc_module.mask_softmax.mask_softmax."""
    nd = x.ndim
    d = dim % nd
    last = (d == nd - 1)
    # TODO(synk): for dim == nd-2 (softmax over sublanes) an axis=-2 in-kernel
    #             reduction would avoid this HBM transpose; moveaxis fallback
    #             is kept for generality.
    xm = x if last else jnp.moveaxis(x, d, -1)
    xs = xm.shape
    D = xs[-1]
    R = math.prod(xs[:-1]) if len(xs) > 1 else 1

    if mask is None:
        out = _softmax_2d(xm.reshape(R, D)).reshape(xs)
        return out if last else jnp.moveaxis(out, -1, d)

    m = mask
    if m.ndim < nd:
        m = m.reshape((1,) * (nd - m.ndim) + m.shape)
    mm = m if last else jnp.moveaxis(m, d, -1)
    mm = _narrow_mask(mm)

    # Mask that only broadcasts over leading dims -> keep it resident in VMEM
    # instead of materializing the broadcast in HBM.
    j = _leading_broadcast_prefix(mm.shape, xs)
    if j is not None and j < nd:
        Rm = math.prod(xs[j:-1]) if j < nd - 1 else 1
        if (Rm < R and Rm >= 8 and R % Rm == 0
                and Rm * D * 4 <= _RESIDENT_MASK_BYTES):
            K = R // Rm
            out = _masked_softmax_resident(
                xm.reshape(K, Rm, D), mm.reshape(1, Rm, D)).reshape(xs)
            return out if last else jnp.moveaxis(out, -1, d)

    # General fallback: stream a full-size mask (materializes the broadcast
    # only when the resident path can't be used).
    mb = jnp.broadcast_to(mm, xs)
    out = _masked_softmax_stream(xm.reshape(R, D), mb.reshape(R, D)).reshape(xs)
    return out if last else jnp.moveaxis(out, -1, d)


def mvmask_softmax_pallas(x, mask=None, dim=-1):
    """JAX/Pallas port of oc_module.mask_softmax.mvmask_softmax.

    mask may be:
      - None                        -> plain softmax
      - an array                    -> mask_softmax
      - [mask0 (N, H, W), mask1]    -> multi-view masked softmax
    """
    if mask is None:
        return mask_softmax_pallas(x, None, dim=dim)
    if not isinstance(mask, (list, tuple)):
        return mask_softmax_pallas(x, mask, dim=dim)

    mask0, mask1 = mask[0], mask[1]
    N, H, W = mask0.shape
    if N == 1:
        # torch branch: softmax masked by mask[0] (shape (1, H, W)), no mask1.
        return mask_softmax_pallas(x, mask0, dim=dim)

    nd = x.ndim
    d = dim % nd
    can_fuse = (d == nd - 1 and nd >= 2
                and int(x.shape[-1]) == int(W) and int(x.shape[-2]) == int(H)
                and H >= 8 and H * W * 4 <= _RESIDENT_MASK_BYTES
                and _broadcastable_to(tuple(mask1.shape), (H, W)))

    if can_fuse:
        K = math.prod(x.shape[:-2])
        x3 = x.reshape(K, H, W)
        m0 = _narrow_mask(mask0).reshape(N, H, W)
        m1 = _narrow_mask(mask1)
        if m1.ndim > 2:
            m1 = m1.reshape(m1.shape[-2:])
        m1 = jnp.broadcast_to(m1, (H, W)).reshape(1, H, W)
        return _mv_fused(x3, m0, m1).reshape(x.shape)

    # Fallback: per-view masked softmax (still Pallas), glued in JAX.
    Sm = mask_softmax_pallas(x, mask0[0], dim=dim)
    for i in range(1, N):
        Sm = Sm + mask_softmax_pallas(x, mask0[i], dim=dim)
    return Sm * mask1


class MaskSoftmax:
    """Equivalent of the PyTorch Mask_Softmax module."""

    def __init__(self, dim=None):
        self.dim = dim

    def __call__(self, inputs):
        x, mask = inputs[0], inputs[1]
        dim = -1 if self.dim is None else self.dim
        return mvmask_softmax_pallas(x, mask, dim=dim)


# ----------------------------------------------------------------------------
# Demo / smoke test
# ----------------------------------------------------------------------------
if __name__ == "__main__":
    key = jax.random.PRNGKey(0)
    kx, km, k0, k1 = jax.random.split(key, 4)

    # NCHW-style input (B, C, H, W); softmax over the last dim (W)
    x = jax.random.normal(kx, (2, 4, 16, 16), dtype=jnp.float32)
    mx = jnp.max(x, axis=-1, keepdims=True)
    e = jnp.exp(x - mx)

    m = MaskSoftmax(dim=-1)

    # 1) full-shape tensor mask -> streamed-mask kernel
    mask_full = (jax.random.uniform(km, (2, 4, 16, 16)) > 0.3).astype(jnp.float32)
    out1 = jax.block_until_ready(m((x, mask_full)))
    me1 = e * mask_full
    ref1 = me1 / (jnp.sum(me1, axis=-1, keepdims=True) + 1e-10)
    assert out1.shape == x.shape
    assert jnp.allclose(out1, ref1, atol=1e-5, rtol=1e-5)

    # 2) broadcast (H, W) mask -> resident-mask kernel (no HBM broadcast)
    mask_hw = (jax.random.uniform(k0, (16, 16)) > 0.3).astype(jnp.float32)
    out2 = jax.block_until_ready(mask_softmax_pallas(x, mask_hw, dim=-1))
    me2 = e * mask_hw
    ref2 = me2 / (jnp.sum(me2, axis=-1, keepdims=True) + 1e-10)
    assert jnp.allclose(out2, ref2, atol=1e-5, rtol=1e-5)

    # 3) multi-view mask list -> single fused kernel
    mask0 = (jax.random.uniform(k1, (3, 16, 16)) > 0.3).astype(jnp.float32)
    mask1 = (jax.random.uniform(km, (16, 16)) > 0.1).astype(jnp.float32)
    out3 = jax.block_until_ready(m((x, [mask0, mask1])))
    Sm = jnp.zeros_like(x)
    for i in range(3):
        mei = e * mask0[i]
        Sm = Sm + mei / (jnp.sum(mei, axis=-1, keepdims=True) + 1e-10)
    ref3 = Sm * mask1
    assert jnp.allclose(out3, ref3, atol=1e-5, rtol=1e-5)

    # 4) mask=None -> plain softmax kernel
    out4 = jax.block_until_ready(mvmask_softmax_pallas(x, None, dim=-1))
    assert jnp.allclose(out4, jax.nn.softmax(x, axis=-1), atol=1e-5, rtol=1e-5)

    print("KERNEL_OK")
</pallas_src>

<mosaic_0001>
module attributes {stable_mosaic.version = 11 : i64} {
  func.func @_masked_softmax_kernel(%arg0: i32, %arg1: memref<64x16xf32, #tpu.memory_space<vmem>>, %arg2: memref<64x16xf32, #tpu.memory_space<vmem>>, %arg3: memref<64x16xf32, #tpu.memory_space<vmem>>) attributes {dimension_semantics = [#tpu.dimension_semantics<parallel>], iteration_bounds = array<i64: 2>, scalar_prefetch = 0 : i64, scratch_operands = 0 : i64, tpu.core_type = #tpu.core_type<tc>, window_params = [{transform_indices = @transform_0, window_bounds = array<i64: 64, 16>}, {transform_indices = @transform_1, window_bounds = array<i64: 64, 16>}, {transform_indices = @transform_2, window_bounds = array<i64: 64, 16>}]} {
    %c0 = arith.constant 0 : index
    %c0_0 = arith.constant 0 : index
    %0 = vector.load %arg1[%c0, %c0_0] : memref<64x16xf32, #tpu.memory_space<vmem>>, vector<64x16xf32>
    %c0_1 = arith.constant 0 : index
    %c0_2 = arith.constant 0 : index
    %1 = vector.load %arg2[%c0_1, %c0_2] : memref<64x16xf32, #tpu.memory_space<vmem>>, vector<64x16xf32>
    %cst = arith.constant dense<0xFF800000> : vector<64xf32>
    %2 = vector.multi_reduction <maximumf>, %0, %cst [1] : vector<64x16xf32> to vector<64xf32>
    %3 = vector.shape_cast %2 : vector<64xf32> to vector<64x1xf32>
    %4 = vector.broadcast %3 : vector<64x1xf32> to vector<64x16xf32>
    %5 = arith.subf %0, %4 : vector<64x16xf32>
    %6 = math.exp %5 : vector<64x16xf32>
    %7 = arith.mulf %6, %1 : vector<64x16xf32>
    %cst_3 = arith.constant dense<0.000000e+00> : vector<64xf32>
    %8 = vector.multi_reduction <add>, %7, %cst_3 [1] : vector<64x16xf32> to vector<64xf32>
    %9 = vector.shape_cast %8 : vector<64xf32> to vector<64x1xf32>
    %cst_4 = arith.constant 1.000000e-10 : f32
    %10 = vector.broadcast %cst_4 : f32 to vector<64x1xf32>
    %11 = arith.addf %9, %10 : vector<64x1xf32>
    %12 = tpu.reciprocal %11 : vector<64x1xf32> -> vector<64x1xf32>
    %13 = vector.broadcast %12 : vector<64x1xf32> to vector<64x16xf32>
    %14 = arith.mulf %7, %13 : vector<64x16xf32>
    %c0_5 = arith.constant 0 : index
    %c0_6 = arith.constant 0 : index
    %15 = vector.load %arg3[%c0_5, %c0_6] : memref<64x16xf32, #tpu.memory_space<vmem>>, vector<64x16xf32>
    tpu.vector_store %arg3[%c0_5, %c0_6], %14 {strides = array<i32>} : memref<64x16xf32, #tpu.memory_space<vmem>>, vector<64x16xf32>,
    return
  }
  func.func @transform_0(%arg0: i32) -> (i32, i32) {
    %c0_i32 = arith.constant 0 : i32
    %c0_i32_0 = arith.constant 0 : i32
    return %arg0, %c0_i32 : i32, i32
  }
  func.func @transform_1(%arg0: i32) -> (i32, i32) {
    %c0_i32 = arith.constant 0 : i32
    %c0_i32_0 = arith.constant 0 : i32
    return %arg0, %c0_i32 : i32, i32
  }
  func.func @transform_2(%arg0: i32) -> (i32, i32) {
    %c0_i32 = arith.constant 0 : i32
    %c0_i32_0 = arith.constant 0 : i32
    return %arg0, %c0_i32 : i32, i32
  }
}

</mosaic_0001>

<bundles_post_ra>
// kernel: tpu_custom_call.1
= control target key start
LH: loop header
LB: loop body
LE: loop exit
PB: predicated region body
PF: predicated region fallthrough
CT: control target
= control target key end

     0   :  { %s546_s9 = smov 0   ;;  %s703_s0 = inlined_call_operand.vmem [shape: f32[128,16], index: 0, kind: input, shape index: {}]   ;;  %s704_s1 = inlined_call_operand.vmem [shape: f32[128,16], index: 1, kind: input, shape index: {}]   ;;  %s705_s2 = inlined_call_operand.vmem [shape: f32[128,16], index: 2, kind: output, shape index: {}]  }
   0x1 LB: > { %s470_s10 = sadd.s32 4294967295, %s529_s9   ;;  %p474_p0 = scmp.ge.s32.totalorder %s529_s9, 1  ;;  %s529_s9 = sphi %s546_s9, %s12_s9  }
   0x2   : > { %p124_p1 = scmp.lt.s32.totalorder %s529_s9, 3 }
   0x4   : > { %p125_p2 = pnand %p474_p0, %p124_p1 }
   0x5   : > { %s475_s11 = sshll.u32 (!%p125_p2), %s470_s10, 3 }
   0x6   : > { %128 = sbr.rel (%p125_p2) target bundleno = 310 (0x136), region = 28  ;;  %p152_p3 = scmp.lt.s32.totalorder (!%p125_p2), %s475_s11, 15 }
   0xb   : > { %s715_s11 = smov (!%p152_p3, %s475_s11), 15  ;;  %vm185_vm0 = vcmask 130048  }
   0xc   : > { %s554_s12 = sshll.u32 %s715_s11, 3 }
   0xd   : > { %s155_s15 = scalar_lea.vmem %s703_s0, %s554_s12  ;;  %s572_s18 = scalar_lea.vmem %s704_s1, %s554_s12 }
   0xe   : > { %v173_v0 = vld [vmem:[%s155_s15 + $0x20] sm:$0xff]  ;;  %v171_v1 = vld [vmem:[%s155_s15 + $0x10] sm:$0xff]  ;;  %v174_v6 = vld [vmem:[%s155_s15 + $0x28] sm:$0xff]  ;;  %s634_s21 = scalar_lea.vmem %s705_s2, %s554_s12 }
   0xf   : > { %v169_v2 = vld [vmem:[%s155_s15] sm:$0xff]  ;;  %v198_v3 = vsel %vm185_vm0, %v173_v0, -inf  ;;  %v192_v4 = vsel %vm185_vm0, %v171_v1, -inf  ;;  %v172_v7 = vld [vmem:[%s155_s15 + $0x18] sm:$0xff]  ;;  %v170_v8 = vld [vmem:[%s155_s15 + $0x8] sm:$0xff]  ;;  %v201_v9 = vsel %vm185_vm0, %v174_v6, -inf }
  0x10   : > { %v186_v5 = vsel %vm185_vm0, %v169_v2, -inf  ;;  %199 = vmax.xlane.f32.xlu2 %v198_v3  ;;  %193 = vmax.xlane.f32.xlu1 %v192_v4  ;;  %v195_v10 = vsel %vm185_vm0, %v172_v7, -inf  ;;  %v189_v11 = vsel %vm185_vm0, %v170_v8, -inf  ;;  %v176_v12 = vld [vmem:[%s155_s15 + $0x38] sm:$0xff]  ;;  %v175_v13 = vld [vmem:[%s155_s15 + $0x30] sm:$0xff]  ;;  %v177_v33 = vld [vmem:[%s572_s18] sm:$0xff] }
  0x11   : > { %187 = vmax.xlane.f32.xlu0 %v186_v5  ;;  %v207_v14 = vsel %vm185_vm0, %v176_v12, -inf  ;;  %v204_v15 = vsel %vm185_vm0, %v175_v13, -inf  ;;  %v179_v30 = vld [vmem:[%s572_s18 + $0x10] sm:$0xff]  ;;  %v182_v44 = vld [vmem:[%s572_s18 + $0x28] sm:$0xff]  ;;  %v180_v47 = vld [vmem:[%s572_s18 + $0x18] sm:$0xff] }
  0x12   : > { %v178_v49 = vld [vmem:[%s572_s18 + $0x8] sm:$0xff]  ;;  %v181_v60 = vld [vmem:[%s572_s18 + $0x20] sm:$0xff]  ;;  %v183_v63 = vld [vmem:[%s572_s18 + $0x30] sm:$0xff] }
  0x13   : > { %v184_v5 = vld [vmem:[%s572_s18 + $0x38] sm:$0xff] }
  0x18   : > { %202 = vmax.xlane.f32.xlu2 %v201_v9  ;;  %196 = vmax.xlane.f32.xlu1 %v195_v10 }
  0x19   : > { %190 = vmax.xlane.f32.xlu0 %v189_v11 }
  0x20   : > { %208 = vmax.xlane.f32.xlu1 %v207_v14 }
  0x21   : > { %205 = vmax.xlane.f32.xlu0 %v204_v15 }
  0x83   : > { %v200_v16 = vpop.xlane.xlu2 %199  ;;  %v194_v17 = vpop.xlane.xlu1 %193 }
  0x84   : > { %v212_v18 = vsub.f32 %v171_v1, %v194_v17  ;;  %v188_v19 = vpop.xlane.xlu0 %187  ;;  %v214_v25 = vsub.f32 %v173_v0, %v200_v16 }
  0x85   : > { %v210_v20 = vsub.f32 %v169_v2, %v188_v19 }
  0x86   : > { %v222_v21 = vmul.f32 1.442695, %v212_v18  ;;  %v226_v37 = vmul.f32 1.442695, %v214_v25 }
  0x87   : > { %v218_v22 = vmul.f32 1.442695, %v210_v20 }
  0x88   : > { %491 = vpow2.f32 %v222_v21 }
  0x89   : > { %493 = vpow2.f32 %v218_v22 }
  0x8b   : > { %v203_v23 = vpop.xlane.xlu2 %202  ;;  %v197_v24 = vpop.xlane.xlu1 %196 }
  0x8c   : > { %v215_v26 = vsub.f32 %v174_v6, %v203_v23  ;;  %v213_v27 = vsub.f32 %v172_v7, %v197_v24  ;;  %v191_v28 = vpop.xlane.xlu0 %190 }
  0x8d   : > { %v211_v29 = vsub.f32 %v170_v8, %v191_v28 }
  0x8e   : > { %v228_v31 = vmul.f32 1.442695, %v215_v26  ;;  %v224_v32 = vmul.f32 1.442695, %v213_v27  ;;  %v492_v34 = vpop.eup %491 }
  0x8f   : > { %v220_v35 = vmul.f32 1.442695, %v211_v29  ;;  %v494_v36 = vpop.eup %493  ;;  %v576_v38 = vmul.f32 %v492_v34, %v179_v30 }
  0x90   : > { %495 = vpow2.f32 %v228_v31  ;;  %v578_v39 = vmul.f32 %v494_v36, %v177_v33 }
  0x91   : > { %497 = vpow2.f32 %v224_v32  ;;  %v248_v40 = vsel %vm185_vm0, %v576_v38, 0.0 }
  0x92   : > { %499 = vpow2.f32 %v220_v35  ;;  %249 = vadd.xlane.f32.xlu1 %v248_v40  ;;  %v242_v41 = vsel %vm185_vm0, %v578_v39, 0.0 }
  0x93   : > { %v209_v42 = vpop.xlane.xlu1 %208  ;;  %501 = vpow2.f32 %v226_v37  ;;  %243 = vadd.xlane.f32.xlu2 %v242_v41 }
  0x94   : > { %v206_v43 = vpop.xlane.xlu0 %205  ;;  %v217_v45 = vsub.f32 %v176_v12, %v209_v42 }
  0x95   : > { %v216_v46 = vsub.f32 %v175_v13, %v206_v43 }
  0x96   : > { %v496_v48 = vpop.eup %495  ;;  %v232_v55 = vmul.f32 1.442695, %v217_v45 }
  0x97   : > { %v498_v50 = vpop.eup %497  ;;  %v230_v51 = vmul.f32 1.442695, %v216_v46  ;;  %v587_v52 = vmul.f32 %v496_v48, %v182_v44 }
  0x98   : > { %v500_v53 = vpop.eup %499  ;;  %v589_v54 = vmul.f32 %v498_v50, %v180_v47 }
  0x99   : > { %503 = vpow2.f32 %v230_v51  ;;  %v257_v56 = vsel %vm185_vm0, %v587_v52, 0.0  ;;  %v593_v57 = vmul.f32 %v500_v53, %v178_v49  ;;  %v502_v58 = vpop.eup %501 }
  0x9a   : > { %v251_v59 = vsel %vm185_vm0, %v589_v54, 0.0  ;;  %258 = vadd.xlane.f32.xlu1 %v257_v56  ;;  %505 = vpow2.f32 %v232_v55  ;;  %v600_v62 = vmul.f32 %v502_v58, %v181_v60 }
  0x9b   : > { %v245_v61 = vsel %vm185_vm0, %v593_v57, 0.0  ;;  %252 = vadd.xlane.f32.xlu2 %v251_v59 }
  0x9c   : > { %246 = vadd.xlane.f32.xlu0 %v245_v61  ;;  %v254_v2 = vsel %vm185_vm0, %v600_v62, 0.0 }
  0x9f   : > { %v504_v0 = vpop.eup %503 }
  0xa0   : > { %v603_v1 = vmul.f32 %v504_v0, %v183_v63  ;;  %v506_v3 = vpop.eup %505 }
  0xa1   : > { %v610_v6 = vmul.f32 %v506_v3, %v184_v5 }
  0xa2   : > { %v260_v4 = vsel %vm185_vm0, %v603_v1, 0.0 }
  0xa3   : > { %261 = vadd.xlane.f32.xlu2 %v260_v4  ;;  %v263_v7 = vsel %vm185_vm0, %v610_v6, 0.0 }
  0xa4   : > { %255 = vadd.xlane.f32.xlu0 %v254_v2 }
  0xac   : > { %264 = vadd.xlane.f32.xlu0 %v263_v7 }
 0x105   : > { %v250_v8 = vpop.xlane.xlu1 %249 }
 0x106   : > { %v268_v9 = vadd.f32 1e-10, %v250_v8  ;;  %v244_v10 = vpop.xlane.xlu2 %243 }
 0x107   : > { %v266_v11 = vadd.f32 1e-10, %v244_v10 }
 0x108   : > { %507 = vrcp.f32 %v268_v9  ;;  %v311_v21 = vand.u32 2147483647, %v268_v9  ;;  %v313_v24 = vand.u32 2147483648, %v268_v9  ;;  %vm307_vm1 = vweird.f32 %v268_v9 }
 0x109   : > { %509 = vrcp.f32 %v266_v11  ;;  %v283_v25 = vand.u32 2147483647, %v266_v11  ;;  %v285_v27 = vand.u32 2147483648, %v266_v11  ;;  %vm279_vm3 = vweird.f32 %v266_v11 }
 0x10a   : > { %vm620_vm5 = vcmp.eq.f32.partialorder %v311_v21, 8.507059e+37  ;;  %v314_v32 = vor.u32 1.1754944e-38, %v313_v24 }
 0x10b   : > { %vm624_vm6 = vcmp.eq.f32.partialorder %v283_v25, 8.507059e+37  ;;  %v286_v36 = vor.u32 1.1754944e-38, %v285_v27 }
 0x10d   : > { %v259_v12 = vpop.xlane.xlu1 %258 }
 0x10e   : > { %v508_v13 = vpop.eup %507  ;;  %v271_v14 = vadd.f32 1e-10, %v259_v12  ;;  %v253_v15 = vpop.xlane.xlu2 %252 }
 0x10f   : > { %v247_v16 = vpop.xlane.xlu0 %246  ;;  %v510_v17 = vpop.eup %509  ;;  %v303_v18 = vmul.f32 %v508_v13, %v268_v9  ;;  %v614_v19 = vadd.f32 1e-10, %v253_v15  ;;  %vm308_vm2 = vweird.f32 %v508_v13 }
 0x110   : > { %v616_v20 = vadd.f32 1e-10, %v247_v16  ;;  %v275_v22 = vmul.f32 %v510_v17, %v266_v11  ;;  %511 = vrcp.f32 %v271_v14  ;;  %vm280_vm4 = vweird.f32 %v510_v17  ;;  %vm309_vm7 = vmor %vm307_vm1, %vm308_vm2 }
 0x111   : > { %v304_v23 = vsub.f32 1.0, %v303_v18  ;;  %513 = vrcp.f32 %v614_v19  ;;  %vm349_vm8 = vweird.f32 %v271_v14  ;;  %v353_v37 = vand.u32 2147483647, %v271_v14  ;;  %vm281_vm9 = vmor %vm279_vm3, %vm280_vm4 }
 0x112   : > { %v276_v26 = vsub.f32 1.0, %v275_v22  ;;  %515 = vrcp.f32 %v616_v20  ;;  %v355_v44 = vand.u32 2147483648, %v271_v14  ;;  %vm321_vm10 = vweird.f32 %v614_v19 }
 0x113   : > { %v305_v28 = vmul.f32 %v508_v13, %v304_v23  ;;  %v325_v48 = vand.u32 2147483647, %v614_v19  ;;  %v327_v59 = vand.u32 2147483648, %v614_v19  ;;  %vm648_vm12 = vcmp.eq.f32.partialorder %v353_v37, 8.507059e+37 }
 0x114   : > { %v277_v29 = vmul.f32 %v510_v17, %v276_v26  ;;  %v356_v2 = vor.u32 1.1754944e-38, %v355_v44  ;;  %v297_v7 = vand.u32 2147483647, %v616_v20  ;;  %v299_v8 = vand.u32 2147483648, %v616_v20 }
 0x115   : > { %v306_v30 = vadd.f32 %v508_v13, %v305_v28  ;;  %vm326_vm2 = vcmp.eq.f32.partialorder %v325_v48, 8.507059e+37  ;;  %v328_v12 = vor.u32 1.1754944e-38, %v327_v59  ;;  %vm293_vm3 = vweird.f32 %v616_v20 }
 0x116   : > { %v512_v34 = vpop.eup %511  ;;  %v278_v35 = vadd.f32 %v510_v17, %v277_v29  ;;  %v262_v49 = vpop.xlane.xlu2 %261  ;;  %v300_v21 = vor.u32 1.1754944e-38, %v299_v8 }
 0x117   : > { %v256_v40 = vpop.xlane.xlu0 %255  ;;  %v514_v41 = vpop.eup %513  ;;  %v310_v42 = vsel %vm309_vm7, %v508_v13, %v306_v30  ;;  %v345_v43 = vmul.f32 %v512_v34, %v271_v14  ;;  %vm350_vm11 = vweird.f32 %v512_v34 }
 0x118   : > { %v315_v45 = vsel %vm620_vm5, %v314_v32, %v310_v42  ;;  %v282_v46 = vsel %vm281_vm9, %v510_v17, %v278_v35  ;;  %v317_v47 = vmul.f32 %v514_v41, %v614_v19  ;;  %v516_v50 = vpop.eup %515  ;;  %v654_v0 = vadd.f32 1e-10, %v256_v40  ;;  %vm659_vm13 = vmor %vm349_vm8, %vm350_vm11 }
 0x119   : > { %v388_v51 = vmul.f32 %v315_v45, %v576_v38  ;;  %v287_v53 = vsel %vm624_vm6, %v286_v36, %v282_v46  ;;  %v346_v55 = vsub.f32 1.0, %v345_v43  ;;  %v289_v60 = vmul.f32 %v516_v50, %v616_v20 }
 0x11a   : > { %v386_v56 = vmul.f32 %v287_v53, %v578_v39  ;;  %v318_v58 = vsub.f32 1.0, %v317_v47  ;;  %v652_v38 = vadd.f32 1e-10, %v262_v49  ;;  %vm322_vm14 = vweird.f32 %v514_v41 }
 0x11b   : > { %396 = vst.msk [vmem:[%s634_s21 + $0x10] sm:$0xff] %vm185_vm0, %v388_v51  ;;  %v347_v61 = vmul.f32 %v512_v34, %v346_v55  ;;  %v290_v4 = vsub.f32 1.0, %v289_v60  ;;  %vm294_vm15 = vweird.f32 %v516_v50  ;;  %vm323_vm1 = vmor %vm321_vm10, %vm322_vm14  ;;  %vm298_vm5 = vcmp.eq.f32.partialorder %v297_v7, 8.507059e+37 }
 0x11c   : > { %394 = vst.msk [vmem:[%s634_s21] sm:$0xff] %vm185_vm0, %v386_v56  ;;  %v319_v3 = vmul.f32 %v514_v41, %v318_v58  ;;  %517 = vrcp.f32 %v652_v38  ;;  %vm295_vm4 = vmor %vm293_vm3, %vm294_vm15  ;;  %vm363_vm6 = vweird.f32 %v652_v38  ;;  %v369_v28 = vand.u32 2147483648, %v652_v38 }
 0x11d   : > { %v348_v5 = vadd.f32 %v512_v34, %v347_v61  ;;  %v291_v10 = vmul.f32 %v516_v50, %v290_v4  ;;  %519 = vrcp.f32 %v654_v0  ;;  %v367_v31 = vand.u32 2147483647, %v652_v38 }
 0x11e   : > { %v320_v9 = vadd.f32 %v514_v41, %v319_v3  ;;  %v341_v32 = vand.u32 2147483648, %v654_v0  ;;  %v339_v33 = vand.u32 2147483647, %v654_v0  ;;  %v370_v36 = vor.u32 1.1754944e-38, %v369_v28 }
 0x11f   : > { %v352_v11 = vsel %vm659_vm13, %v512_v34, %v348_v5  ;;  %v265_v13 = vpop.xlane.xlu0 %264  ;;  %v292_v16 = vadd.f32 %v516_v50, %v291_v10  ;;  %vm335_vm10 = vweird.f32 %v654_v0  ;;  %vm368_vm11 = vcmp.eq.f32.partialorder %v367_v31, 8.507059e+37 }
 0x120   : > { %v357_v14 = vsel %vm648_vm12, %v356_v2, %v352_v11  ;;  %v324_v15 = vsel %vm323_vm1, %v514_v41, %v320_v9  ;;  %v273_v23 = vadd.f32 1e-10, %v265_v13  ;;  %v342_v42 = vor.u32 1.1754944e-38, %v341_v32 }
 0x121   : > { %v391_v17 = vmul.f32 %v357_v14, %v587_v52  ;;  %v329_v18 = vsel %vm326_vm2, %v328_v12, %v324_v15  ;;  %v296_v22 = vsel %vm295_vm4, %v516_v50, %v292_v16  ;;  %vm340_vm13 = vcmp.eq.f32.partialorder %v339_v33, 8.507059e+37 }
 0x122   : > { %v389_v19 = vmul.f32 %v329_v18, %v589_v54  ;;  %v518_v24 = vpop.eup %517  ;;  %v301_v25 = vsel %vm298_vm5, %v300_v21, %v296_v22  ;;  %521 = vrcp.f32 %v273_v23  ;;  %v383_v48 = vand.u32 2147483648, %v273_v23 }
 0x123   : > { %399 = vst.msk [vmem:[%s634_s21 + $0x28] sm:$0xff] %vm185_vm0, %v391_v17  ;;  %v520_v26 = vpop.eup %519  ;;  %v387_v20 = vmul.f32 %v301_v25, %v593_v57  ;;  %v359_v52 = vmul.f32 %v518_v24, %v652_v38  ;;  %vm364_vm7 = vweird.f32 %v518_v24  ;;  %v381_v51 = vand.u32 2147483647, %v273_v23 }
 0x124   : > { %397 = vst.msk [vmem:[%s634_s21 + $0x18] sm:$0xff] %vm185_vm0, %v389_v19  ;;  %v331_v27 = vmul.f32 %v520_v26, %v654_v0  ;;  %vm336_vm8 = vweird.f32 %v520_v26  ;;  %vm365_vm9 = vmor %vm363_vm6, %vm364_vm7  ;;  %vm377_vm15 = vweird.f32 %v273_v23  ;;  %v384_v55 = vor.u32 1.1754944e-38, %v383_v48 }
 0x125   : > { %395 = vst.msk [vmem:[%s634_s21 + $0x8] sm:$0xff] %vm185_vm0, %v387_v20  ;;  %v360_v54 = vsub.f32 1.0, %v359_v52  ;;  %vm337_vm12 = vmor %vm335_vm10, %vm336_vm8  ;;  %vm382_vm2 = vcmp.eq.f32.partialorder %v381_v51, 8.507059e+37 }
 0x126   : > { %v332_v29 = vsub.f32 1.0, %v331_v27 }
 0x127   : > { %v361_v30 = vmul.f32 %v518_v24, %v360_v54 }
 0x128   : > { %v333_v57 = vmul.f32 %v520_v26, %v332_v29  ;;  %v522_v34 = vpop.eup %521 }
 0x129   : > { %v362_v35 = vadd.f32 %v518_v24, %v361_v30  ;;  %v373_v40 = vmul.f32 %v522_v34, %v273_v23  ;;  %vm378_vm14 = vweird.f32 %v522_v34 }
 0x12a   : > { %v334_v37 = vadd.f32 %v520_v26, %v333_v57  ;;  %vm379_vm1 = vmor %vm377_vm15, %vm378_vm14 }
 0x12b   : > { %v366_v41 = vsel %vm365_vm9, %v518_v24, %v362_v35  ;;  %v374_v45 = vsub.f32 1.0, %v373_v40 }
 0x12c   : > { %v371_v43 = vsel %vm368_vm11, %v370_v36, %v366_v41  ;;  %v338_v44 = vsel %vm337_vm12, %v520_v26, %v334_v37 }
 0x12d   : > { %v392_v46 = vmul.f32 %v371_v43, %v603_v1  ;;  %v343_v47 = vsel %vm340_vm13, %v342_v42, %v338_v44  ;;  %v375_v50 = vmul.f32 %v522_v34, %v374_v45 }
 0x12e   : > { %v390_v49 = vmul.f32 %v343_v47, %v600_v62 }
 0x12f   : > { %400 = vst.msk [vmem:[%s634_s21 + $0x30] sm:$0xff] %vm185_vm0, %v392_v46  ;;  %v376_v53 = vadd.f32 %v522_v34, %v375_v50 }
 0x130   : > { %398 = vst.msk [vmem:[%s634_s21 + $0x20] sm:$0xff] %vm185_vm0, %v390_v49 }
 0x131   : > { %v380_v56 = vsel %vm379_vm1, %v522_v34, %v376_v53 }
 0x132   : > { %v385_v58 = vsel %vm382_vm2, %v384_v55, %v380_v56 }
 0x133   : > { %v393_v1 = vmul.f32 %v385_v58, %v610_v6 }
 0x135   : > { %401 = vst.msk [vmem:[%s634_s21 + $0x38] sm:$0xff] %vm185_vm0, %v393_v1 }
 0x136 PF: > { %s12_s9 = sadd.s32 1, %s529_s9  }
 0x137   : > { %p9_p4 = scmp.ge.s32.totalorder %s12_s9, 4  }
 0x139   :  { %11 = sbr.rel (!%p9_p4) target bundleno = 1 (0x1), region = 61 }

</bundles_post_ra>
